<compile_context>
chip_gen: v7x
topology: tpu7x:2x2x1
jax: 0.10.0
libtpu: 0.0.40
codegen_flags: <defaults>
</compile_context>

<pallas_src>
import functools

import jax
import jax.numpy as jnp
from jax.experimental import pallas as pl
from jax.experimental.pallas import tpu as pltpu


def _attn_heads_kernel(x_ref, w_ref, b_ref, o_ref, *, n_heads, d_head):
    # x_ref: (1, tS, H*D)   natural layout, lane-dense load
    # w_ref: (H*D, H*D)     block-diagonal of W.T (grid-invariant)
    # b_ref: (1, H*D)       bias tiled per head
    # o_ref: (1, H, tS, D)  per-head output slabs (contiguous batch slice)
    x = x_ref[0]                                                  # (tS, H*D)
    y = jnp.dot(x, w_ref[...], preferred_element_type=jnp.float32)
    y = y + b_ref[...]                                            # (tS, H*D) f32
    # Head split via static lane slices: VMEM-only relayout, no HBM pass.
    for h in range(n_heads):
        o_ref[0, h, :, :] = y[:, h * d_head:(h + 1) * d_head].astype(o_ref.dtype)


def _pick_seq_tile(seqlen):
    # Largest convenient sublane-aligned tile that divides seqlen; keeps each
    # double-buffered tile well under the v7x 32 MiB scoped-VMEM default.
    for t in (1024, 512, 256, 128, 64, 32, 16, 8):
        if seqlen % t == 0:
            return t
    return seqlen  # full-extent block (always legal)


@functools.partial(jax.jit, static_argnames=("n_heads", "d_head"))
def compute_attention_heads(x, weight, bias, *, n_heads, d_head):
    """x: (batch, seqlen, n_heads*d_head) -> (batch*n_heads, seqlen, d_head)."""
    batch, seqlen, d_model = x.shape
    assert d_model == n_heads * d_head

    # Hoisted one-time weight prep (tiny): nn.Linear is y = x @ W.T + b.
    # Block-diagonal kron(I_H, W.T) lets one matmul project every head of a
    # lane-dense x tile; bias is tiled to match the packed layout.
    w_bd = jnp.kron(jnp.eye(n_heads, dtype=weight.dtype), weight.T)   # (H*D, H*D)
    b_tiled = jnp.tile(bias.reshape(1, d_head), (1, n_heads))         # (1, H*D)

    ts = _pick_seq_tile(seqlen)
    grid = (batch, seqlen // ts)
    hd = n_heads * d_head

    out4 = pl.pallas_call(
        functools.partial(_attn_heads_kernel, n_heads=n_heads, d_head=d_head),
        out_shape=jax.ShapeDtypeStruct((batch, n_heads, seqlen, d_head),
                                       jnp.float32),
        grid_spec=pltpu.PrefetchScalarGridSpec(
            num_scalar_prefetch=0,
            grid=grid,
            in_specs=[
                # x in natural layout: lane-dense (tS, H*D) tiles, no transpose.
                pl.BlockSpec((1, ts, hd), lambda b, s: (b, s, 0)),
                # Grid-invariant packed weight / bias (DMA'd once, revisited).
                pl.BlockSpec((hd, hd), lambda b, s: (0, 0)),
                pl.BlockSpec((1, hd), lambda b, s: (0, 0)),
            ],
            # Output written as (B, H, S, D): the PyTorch transpose is folded
            # into this index_map instead of a separate HBM pass.
            out_specs=pl.BlockSpec((1, n_heads, ts, d_head),
                                   lambda b, s: (b, 0, s, 0)),
        ),
        compiler_params=pltpu.CompilerParams(
            dimension_semantics=("parallel", "parallel")),
    )(x, w_bd, b_tiled)

    # (B, H, S, D) -> (B*H, S, D): contiguous leading-dim merge, no data movement.
    return out4.reshape(batch * n_heads, seqlen, d_head)


def _reference(x, weight, bias, n_heads, d_head):
    batch, seqlen, _ = x.shape
    res = x.reshape(batch, seqlen, n_heads, d_head)
    res = jnp.transpose(res, (0, 2, 1, 3)).reshape(-1, seqlen, d_head)
    return res @ weight.T + bias


if __name__ == "__main__":
    batch, seqlen = 2, 8
    n_heads, d_head = 2, 64

    key = jax.random.PRNGKey(0)
    kx, kw, kb = jax.random.split(key, 3)

    x = jax.random.normal(kx, (batch, seqlen, n_heads * d_head), dtype=jnp.float32)

    # Deterministic nn.Linear(d_head, d_head)-style init (PyTorch uniform bound).
    bound = 1.0 / (d_head ** 0.5)
    weight = jax.random.uniform(kw, (d_head, d_head), jnp.float32, -bound, bound)
    bias = jax.random.uniform(kb, (d_head,), jnp.float32, -bound, bound)

    out = compute_attention_heads(x, weight, bias, n_heads=n_heads, d_head=d_head)
    out = jax.block_until_ready(out)

    ref = _reference(x, weight, bias, n_heads, d_head)
    assert out.shape == (batch * n_heads, seqlen, d_head)
    assert jnp.allclose(out, ref, atol=1e-5, rtol=1e-5)

    print("KERNEL_OK")
</pallas_src>

<mosaic_0001>
module attributes {stable_mosaic.version = 11 : i64} {
  func.func @_attn_heads_kernel(%arg0: i32, %arg1: i32, %arg2: memref<1x8x128xf32, #tpu.memory_space<vmem>>, %arg3: memref<128x128xf32, #tpu.memory_space<vmem>>, %arg4: memref<1x128xf32, #tpu.memory_space<vmem>>, %arg5: memref<1x2x8x64xf32, #tpu.memory_space<vmem>>) attributes {dimension_semantics = [#tpu.dimension_semantics<parallel>, #tpu.dimension_semantics<parallel>], iteration_bounds = array<i64: 2, 1>, scalar_prefetch = 0 : i64, scratch_operands = 0 : i64, tpu.core_type = #tpu.core_type<tc>, window_params = [{transform_indices = @transform_0, window_bounds = array<i64: 1, 8, 128>}, {pipeline_mode = #tpu.pipeline_mode<synchronous>, transform_indices = @transform_1, window_bounds = array<i64: 128, 128>}, {pipeline_mode = #tpu.pipeline_mode<synchronous>, transform_indices = @transform_2, window_bounds = array<i64: 1, 128>}, {transform_indices = @transform_3, window_bounds = array<i64: 1, 2, 8, 64>}]} {
    %c0 = arith.constant 0 : index
    %c0_0 = arith.constant 0 : index
    %c0_1 = arith.constant 0 : index
    %0 = vector.load %arg2[%c0, %c0_0, %c0_1] : memref<1x8x128xf32, #tpu.memory_space<vmem>>, vector<1x8x128xf32>
    %1 = vector.shape_cast %0 : vector<1x8x128xf32> to vector<8x128xf32>
    %c0_2 = arith.constant 0 : index
    %c0_3 = arith.constant 0 : index
    %2 = vector.load %arg3[%c0_2, %c0_3] : memref<128x128xf32, #tpu.memory_space<vmem>>, vector<128x128xf32>
    %cst = arith.constant dense<0.000000e+00> : vector<8x128xf32>
    %3 = tpu.matmul %1, %2, %cst {dimension_numbers = #tpu.dot_dimension_numbers<[1], [0], [0], [1], [0, 0, 1, 1], [], []>} : vector<8x128xf32>, vector<128x128xf32>, vector<8x128xf32> -> vector<8x128xf32>
    %c0_4 = arith.constant 0 : index
    %c0_5 = arith.constant 0 : index
    %4 = vector.load %arg4[%c0_4, %c0_5] : memref<1x128xf32, #tpu.memory_space<vmem>>, vector<1x128xf32>
    %5 = vector.broadcast %4 : vector<1x128xf32> to vector<8x128xf32>
    %6 = arith.addf %3, %5 : vector<8x128xf32>
    %7 = vector.extract_strided_slice %6 {offsets = [0, 0], sizes = [8, 64], strides = [1, 1]} : vector<8x128xf32> to vector<8x64xf32>
    %c0_6 = arith.constant 0 : index
    %c0_7 = arith.constant 0 : index
    %c0_8 = arith.constant 0 : index
    %c0_9 = arith.constant 0 : index
    %8 = vector.load %arg5[%c0_6, %c0_7, %c0_8, %c0_9] : memref<1x2x8x64xf32, #tpu.memory_space<vmem>>, vector<1x1x8x64xf32>
    %9 = vector.shape_cast %8 : vector<1x1x8x64xf32> to vector<8x64xf32>
    %10 = vector.shape_cast %7 : vector<8x64xf32> to vector<1x1x8x64xf32>
    tpu.vector_store %arg5[%c0_6, %c0_7, %c0_8, %c0_9], %10 {strides = array<i32>} : memref<1x2x8x64xf32, #tpu.memory_space<vmem>>, vector<1x1x8x64xf32>,
    %11 = vector.extract_strided_slice %6 {offsets = [0, 64], sizes = [8, 64], strides = [1, 1]} : vector<8x128xf32> to vector<8x64xf32>
    %c0_10 = arith.constant 0 : index
    %c1 = arith.constant 1 : index
    %c0_11 = arith.constant 0 : index
    %c0_12 = arith.constant 0 : index
    %12 = vector.load %arg5[%c0_10, %c1, %c0_11, %c0_12] : memref<1x2x8x64xf32, #tpu.memory_space<vmem>>, vector<1x1x8x64xf32>
    %13 = vector.shape_cast %12 : vector<1x1x8x64xf32> to vector<8x64xf32>
    %14 = vector.shape_cast %11 : vector<8x64xf32> to vector<1x1x8x64xf32>
    tpu.vector_store %arg5[%c0_10, %c1, %c0_11, %c0_12], %14 {strides = array<i32>} : memref<1x2x8x64xf32, #tpu.memory_space<vmem>>, vector<1x1x8x64xf32>,
    return
  }
  func.func @transform_0(%arg0: i32, %arg1: i32) -> (i32, i32, i32) {
    %c0_i32 = arith.constant 0 : i32
    %c0_i32_0 = arith.constant 0 : i32
    return %arg0, %arg1, %c0_i32 : i32, i32, i32
  }
  func.func @transform_1(%arg0: i32, %arg1: i32) -> (i32, i32) {
    %c0_i32 = arith.constant 0 : i32
    %c0_i32_0 = arith.constant 0 : i32
    %c0_i32_1 = arith.constant 0 : i32
    return %c0_i32, %c0_i32_0 : i32, i32
  }
  func.func @transform_2(%arg0: i32, %arg1: i32) -> (i32, i32) {
    %c0_i32 = arith.constant 0 : i32
    %c0_i32_0 = arith.constant 0 : i32
    %c0_i32_1 = arith.constant 0 : i32
    return %c0_i32, %c0_i32_0 : i32, i32
  }
  func.func @transform_3(%arg0: i32, %arg1: i32) -> (i32, i32, i32, i32) {
    %c0_i32 = arith.constant 0 : i32
    %c0_i32_0 = arith.constant 0 : i32
    %c0_i32_1 = arith.constant 0 : i32
    return %arg0, %c0_i32, %arg1, %c0_i32_0 : i32, i32, i32, i32
  }
}

</mosaic_0001>

<bundles_post_ra>
// kernel: compute_attention_heads.1
= control target key start
LH: loop header
LB: loop body
LE: loop exit
PB: predicated region body
PF: predicated region fallthrough
CT: control target
= control target key end

     0   :  { %8 = vsyncpa [#allocation3], 0  ;;  %s808_s0 = inlined_call_operand.vmem [shape: f32[2,8,128], index: 0, kind: input, shape index: {}]   ;;  %s809_s1 = inlined_call_operand.vmem [shape: f32[128,128], index: 1, kind: input, shape index: {}]   ;;  %s810_s2 = inlined_call_operand.vmem [shape: f32[1,128], index: 2, kind: input, shape index: {}]   ;;  %s811_s3 = inlined_call_operand.hbm [shape: f32[2,2,8,64], index: 3, kind: output, shape index: {}]  }
   0x1   :  { %10 = vsyncpa [#allocation3 + $0x1], 0  ;;  %s642_s12 = smov 0   ;;  %s644_s13 = smov 0  }
   0x2   :  { %s646_s14 = smov 0   ;;  %s648_s15 = smov 0  }
   0x3   :  { %s650_s16 = smov 0   ;;  %s652_s17 = smov 0  }
   0x4 LB: > { %s383_s18 = sadd.s32 4294967295, %s613_s17   ;;  %s384_s19 = sadd.s32 4294967294, %s613_s17   ;;  %s613_s17 = sphi %s652_s17, %s16_s17   ;;  %s609_s16 = sphi %s650_s16, %s818_s16   ;;  %s605_s15 = sphi %s648_s15, %s817_s15   ;;  %s601_s14 = sphi %s646_s14, %s816_s14   ;;  %s597_s13 = sphi %s644_s13, %s815_s13   ;;  %s593_s12 = sphi %s642_s12, %s814_s12  }
   0x5   : > { %s28_s20 = sadd.s32 1, %s609_s16  ;;  %s107_s21 = sadd.s32 1, %s601_s14 }
   0x6   : > { %p30_p0 = scmp.ge.s32.totalorder %s28_s20, 2  ;;  %p117_p1 = scmp.ne.s32.totalorder %s601_s14, %s597_s13 }
   0x7   : > { %p118_p2 = scmp.eq.s32.totalorder %s383_s18, 1  ;;  %p123_p3 = scmp.ne.s32.totalorder %s597_s13, %s593_s12 }
   0x8   : > { %s820_s20 = smov (%p30_p0, %s28_s20), 0  ;;  %p124_p5 = scmp.eq.s32.totalorder %s384_s19, 1 }
   0x9   : > { %p682_p4 = por %p118_p2, %p117_p1  ;;  %s102_s23 = ssub.s32 %s609_s16, %s820_s20 }
   0xa   : > { %p387_p6 = scmp.ge.s32.totalorder %s613_s17, 1  ;;  %p105_p7 = scmp.eq.s32.totalorder %s102_s23, 0 }
   0xb   : > { %p689_p8 = por %p124_p5, %p123_p3  ;;  %p158_p9 = scmp.lt.s32.totalorder %s613_s17, 3 }
   0xc   : > { %s695_s25 = scalar_select %p105_p7, %s601_s14, %s107_s21  }
   0xd   : > { %p159_p10 = pnand %p387_p6, %p158_p9 }
   0xe   : > { %v192_v0 = vld [vmem:[%s809_s1] sm:$0xff] (!%p159_p10)  ;;  %v193_v1 = vld [vmem:[%s809_s1 + $0x8] sm:$0xff] (!%p159_p10)  ;;  %v194_v2 = vld [vmem:[%s809_s1 + $0x10] sm:$0xff] (!%p159_p10)  ;;  %v615_v3 = vmov (!%p159_p10), 0.0|0.0   ;;  %vm616_vm0 = vmmov (!%p159_p10), 0   ;;  %v617_v6 = vmov (!%p159_p10), 0.0  }
   0xf   : > { %162 = sbr.rel (%p159_p10) target bundleno = 392 (0x188), region = 32  ;;  %450 = vmatprep.subr.bf16.mxu0 (!%p159_p10), %v615_v3  ;;  %v451_v4 = vpack.c.bf16 (!%p159_p10), %v193_v1, %v192_v0  ;;  %v195_v5 = vld [vmem:[%s809_s1 + $0x18] sm:$0xff] (!%p159_p10)  ;;  %447 = vmatprep.mubr.msk.f32.mxu0 (!%p159_p10), %vm616_vm0, %v617_v6  ;;  %v196_v8 = vld [vmem:[%s809_s1 + $0x20] sm:$0xff] (!%p159_p10)  ;;  %v197_v9 = vld [vmem:[%s809_s1 + $0x28] sm:$0xff] (!%p159_p10)  ;;  %p184_p11 = scmp.lt.s32.totalorder (!%p159_p10), %s605_s15, 1  ;;  %vm285_vm1 = vcmask (!%p159_p10), 523264  }
  0x10   : > { %v454_v7 = vpack.c.bf16 (!%p159_p10), %v195_v5, %v194_v2  ;;  %v457_v10 = vpack.c.bf16 (!%p159_p10), %v197_v9, %v196_v8  ;;  %v198_v11 = vld [vmem:[%s809_s1 + $0x30] sm:$0xff] (!%p159_p10)  ;;  %v199_v12 = vld [vmem:[%s809_s1 + $0x38] sm:$0xff] (!%p159_p10)  ;;  %v200_v14 = vld [vmem:[%s809_s1 + $0x40] sm:$0xff] (!%p159_p10)  ;;  %s181_s29 = sand.u32 (!%p159_p10), 1, %s597_s13   ;;  %s618_s6 = smov (!%p159_p10), 64  }
  0x11   : > { %452 = vmatpush3.bf16.msra.mxu0 (!%p159_p10), %v451_v4  ;;  %v460_v13 = vpack.c.bf16 (!%p159_p10), %v199_v12, %v198_v11  ;;  %v201_v15 = vld [vmem:[%s809_s1 + $0x48] sm:$0xff] (!%p159_p10)  ;;  %v202_v17 = vld [vmem:[%s809_s1 + $0x50] sm:$0xff] (!%p159_p10)  ;;  %v203_v18 = vld [vmem:[%s809_s1 + $0x58] sm:$0xff] (!%p159_p10)  ;;  %s388_s30 = sshll.u32 (!%p159_p10), %s181_s29, 4  ;;  %s397_s9 = sshll.u32 (!%p159_p10), %s605_s15, 8 }
  0x12   : > { %453 = vmatprep.subr.bf16.mxu0 (!%p159_p10), %v615_v3  ;;  %v463_v16 = vpack.c.bf16 (!%p159_p10), %v201_v15, %v200_v14  ;;  %v466_v19 = vpack.c.bf16 (!%p159_p10), %v203_v18, %v202_v17  ;;  %v204_v20 = vld [vmem:[%s809_s1 + $0x60] sm:$0xff] (!%p159_p10)  ;;  %v205_v21 = vld [vmem:[%s809_s1 + $0x68] sm:$0xff] (!%p159_p10)  ;;  %v206_v23 = vld [vmem:[%s809_s1 + $0x70] sm:$0xff] (!%p159_p10)  ;;  %s183_s7 = scalar_lea.vmem (!%p159_p10), [#allocation2], %s388_s30  ;;  %s760_s18 = scalar_lea.hbm (!%p159_p10), %s811_s3, %s397_s9 }
  0x13   : > { %v469_v22 = vpack.c.bf16 (!%p159_p10), %v205_v21, %v204_v20  ;;  %v207_v24 = vld [vmem:[%s809_s1 + $0x78] sm:$0xff] (!%p159_p10)  ;;  %v390_v27 = vld [vmem:[%s810_s2] ss:$0 sm:$0xff] (!%p159_p10)  ;;  %s308_s8 = sshll.u32 (!%p159_p10), %s183_s7, 4  ;;  %s762_s19 = scalar_lea.sflag (!%p159_p10), [#allocation3], %s181_s29  ;;  %s755_s8 = int_to_ptr.vmem [resolvable:$true] %s308_s8 }
  0x14   : > { %v472_v25 = vpack.c.bf16 (!%p159_p10), %v207_v24, %v206_v23  ;;  %s535_s21 = scalar_lea.vmem (!%p159_p10), %s755_s8, 256 }
  0x15   : > { %455 = vmatpush3.bf16.msra.mxu0 (!%p159_p10), %v454_v7  ;;  %p536_p12 = scmp.ne.s32.totalorder (!%p159_p10), %s755_s8, %s535_s21 }
  0x16   : > { %456 = vmatprep.subr.bf16.mxu0 %v615_v3  ;;  %s185_s10 = scalar_select %p184_p11, %s605_s15, 1 }
  0x17   : > { %p537_p13 = pnand %p536_p12, %p682_p4  ;;  %s619_s15 = smov [#allocation2]  }
  0x18   : > { %s389_s23 = sshll.u32 %s185_s10, 3 }
  0x19   : > { %458 = vmatpush3.bf16.msra.mxu0 %v457_v10  ;;  %s190_s28 = scalar_lea.vmem %s808_s0, %s389_s23  ;;  %p538_p0 = pneg %p537_p13 }
  0x1a   : > { %459 = vmatprep.subr.bf16.mxu0 %v615_v3  ;;  %v191_v26 = vld [vmem:[%s190_s28] sm:$0xff]  ;;  %s539_s23 = sshll.u32 %s619_s15, 4  ;;  %s540_s23 = int_to_ptr.vmem [resolvable:$false] %s539_s23 }
  0x1b   : > { %s541_s26 = scalar_lea.vmem %s540_s23, 512  ;;  %p542_p1 = scmp.lt.s32.totalorder %s755_s8, %s540_s23 }
  0x1c   : > { %p543_p2 = scmp.lt.s32.totalorder %s541_s26, %s535_s21 }
  0x1d   : > { %461 = vmatpush3.bf16.msra.mxu0 %v460_v13 }
  0x1e   : > { %462 = vmatprep.subr.bf16.mxu0 %v615_v3  ;;  %p544_p3 = por %p543_p2, %p542_p1 }
  0x20   : > { %p545_p5 = pnand %p544_p3, %p538_p0 }
  0x21   : > { %464 = vmatpush3.bf16.msra.mxu0 %v463_v16 }
  0x22   : > { %465 = vmatprep.subr.bf16.mxu0 %v615_v3 }
  0x25   : > { %467 = vmatpush3.bf16.msra.mxu0 %v466_v19 }
  0x26   : > { %468 = vmatprep.subr.bf16.mxu0 %v615_v3 }
  0x29   : > { %470 = vmatpush3.bf16.msra.mxu0 %v469_v22 }
  0x2a   : > { %471 = vmatprep.subr.bf16.mxu0 %v615_v3 }
  0x2d   : > { %473 = vmatpush3.bf16.msra.mxu0 %v472_v25 }
  0x30   : > { %448 = vmatmul.mubr.f32.vlgmr.msra.gmra.mrb[0].mxu0 %v191_v26 }
 0x103   : > { %v281_v28 = vpop.f32.mrb[0].mxu0 }
 0x104   : > { %v282_v29 = vadd.f32 %v390_v27, %v281_v28  ;;  %v449_v30 = vpop.f32.mrb[1].mxu0 }
 0x106   : > { %288 = vrot.lane.b32.xlu0 %v282_v29, %s618_s6  ;;  %286 = vst.msk [vmem:[%s183_s7] sm:$0xff] %vm285_vm1, %v282_v29 }
 0x178   : > { %v289_v31 = vpop.permute.xlu0 %288 }
 0x179   : > { %391 = vst.msk [vmem:[%s183_s7 + $0x8] sm:$0xff] %vm285_vm1, %v289_v31 }
 0x17a   : > { %548 = shalt.err (!%p545_p5)
}
 0x17b   : > { %s549_s27 = scalar_lea.hbm %s760_s18, 256  ;;  %s553_s30 = scalar_lea.hbm %s811_s3, 512 }
 0x17c   : > { %p550_p6 = scmp.ne.s32.totalorder %s760_s18, %s549_s27  ;;  %p554_p10 = scmp.lt.u32.totalorder %s760_s18, %s811_s3 }
 0x17d   : > { %p555_p11 = scmp.lt.u32.totalorder %s553_s30, %s549_s27  ;;  %p557_p13 = scmp.lt.u32.totalorder %s549_s27, %s760_s18 }
 0x17e   : > { %p551_p7 = pnand %p550_p6, %p682_p4 }
 0x17f   : > { %p556_p12 = por %p555_p11, %p554_p10 }
 0x180   : > { %p552_p9 = pneg %p551_p7 }
 0x181   : > { %p558_p0 = por %p557_p13, %p556_p12 }
 0x183   : > { %p559_p1 = pnand %p558_p0, %p552_p9 }
 0x185   : > { %562 = shalt.err (!%p559_p1)
}
 0x186   : > { %s620_s6 = smov 128   ;;  %s621_s7 = smov 8  }
 0x187   : > { %474 = dma.vmem_to_hbm [thread:$0]  (%p682_p4), %s755_s8, 256, %s760_s18, %s762_s19, %s620_s6, %s620_s6, %s621_s7  }
 0x188 PF: > { %p480_p2 = scmp.ge.s32.totalorder %s613_s17, 2  ;;  %s323_s9 = sand.u32 1, %s593_s12  }
 0x189   : > { %s324_s10 = scalar_lea.sflag [#allocation3], %s323_s9 }
 0x18a   : > { %p477_p3 = pnand %p480_p2, %p689_p8 }
 0x18c   : > { %588 = dma.done.wait (!%p477_p3), %s324_s10, 256  }
 0x18d   : > { %590 = vsyncadd (!%p477_p3), %s324_s10, 4294967040  ;;  %s16_s17 = sadd.s32 1, %s613_s17   ;;  %s814_s12 = smov %s597_s13 }
 0x18e   : > { %p13_p5 = scmp.ge.s32.totalorder %s16_s17, 4   ;;  %s815_s13 = smov %s601_s14 }
 0x18f   : > { %s816_s14 = smov %s695_s25  ;;  %s817_s15 = smov %s609_s16 }
 0x190   : > { %s818_s16 = smov %s820_s20  ;;  %15 = sbr.rel (!%p13_p5) target bundleno = 4 (0x4), region = 68 }
 0x197   :  { %329 = vsyncpa [#allocation3], 1 }
 0x198   :  { %331 = vsyncpa [#allocation3 + $0x1], 1 }

</bundles_post_ra>
